<compile_context>
chip_gen: v5e
topology: v5e:2x2
jax: 0.10.0
libtpu: 0.0.40
codegen_flags: <defaults>
</compile_context>

<pallas_src>
import functools

import jax
import jax.numpy as jnp
from jax.experimental import pallas as pl
from jax.experimental.pallas import tpu as pltpu


def _round_up(x, m):
    return (x + m - 1) // m * m


# ---------------------------------------------------------------------------
# Pallas kernels: (tm, K) x (K, tn) + (1, tn) -> (tm, tn)
# ---------------------------------------------------------------------------
def _proj_kernel_single_k(p_ref, w_ref, b_ref, o_ref):
    # Single-shot contraction: no accumulator scratch; bias fused into the
    # one (lane-dense) store. Operands are bf16, accumulation is f32.
    o_ref[...] = (
        jnp.dot(p_ref[...], w_ref[...], preferred_element_type=jnp.float32)
        + b_ref[...]
    ).astype(o_ref.dtype)


def _proj_kernel_tiled_k(p_ref, w_ref, b_ref, o_ref, acc_ref):
    # Fallback for very large K: K innermost ("arbitrary"), f32 accumulator.
    k = pl.program_id(2)

    @pl.when(k == 0)
    def _():
        acc_ref[...] = jnp.zeros_like(acc_ref)

    acc_ref[...] += jnp.dot(
        p_ref[...], w_ref[...], preferred_element_type=jnp.float32
    )

    @pl.when(k == pl.num_programs(2) - 1)
    def _():
        o_ref[...] = (acc_ref[...] + b_ref[...]).astype(o_ref.dtype)


def _patch_proj(patches, weight_t, bias, *, compute_dtype=jnp.bfloat16):
    """patches: (M, K), weight_t: (K, N), bias: (N,) f32 -> (M, N) f32."""
    M, K = patches.shape
    Kw, N = weight_t.shape
    assert Kw == K

    # ---- pad to TPU-friendly shapes (lane-dense N, 128-aligned K) ---------
    n_pad = _round_up(N, 128)
    k_pad = _round_up(K, 128)
    tm = 256 if M >= 256 else _round_up(M, 8)
    m_pad = _round_up(M, tm)
    tn = 256 if n_pad % 256 == 0 else 128

    p = patches.astype(compute_dtype)
    w = weight_t.astype(compute_dtype)
    if (m_pad, k_pad) != (M, K):
        p = jnp.pad(p, ((0, m_pad - M), (0, k_pad - K)))
    if (k_pad, n_pad) != (K, N):
        w = jnp.pad(w, ((0, k_pad - K), (0, n_pad - N)))
    b = jnp.pad(bias.astype(jnp.float32), (0, n_pad - N)).reshape(1, n_pad)

    out_shape = jax.ShapeDtypeStruct((m_pad, n_pad), jnp.float32)

    if k_pad <= 1024:
        out = pl.pallas_call(
            _proj_kernel_single_k,
            out_shape=out_shape,
            grid=(m_pad // tm, n_pad // tn),
            in_specs=[
                pl.BlockSpec((tm, k_pad), lambda i, j: (i, 0)),
                pl.BlockSpec((k_pad, tn), lambda i, j: (0, j)),
                pl.BlockSpec((1, tn), lambda i, j: (0, j)),
            ],
            out_specs=pl.BlockSpec((tm, tn), lambda i, j: (i, j)),
            compiler_params=pltpu.CompilerParams(
                dimension_semantics=("parallel", "parallel"),
                vmem_limit_bytes=48 * 1024 * 1024,
            ),
        )(p, w, b)
    else:
        tk = 512 if k_pad % 512 == 0 else (256 if k_pad % 256 == 0 else 128)
        out = pl.pallas_call(
            _proj_kernel_tiled_k,
            out_shape=out_shape,
            grid=(m_pad // tm, n_pad // tn, k_pad // tk),
            in_specs=[
                pl.BlockSpec((tm, tk), lambda i, j, k: (i, k)),
                pl.BlockSpec((tk, tn), lambda i, j, k: (k, j)),
                pl.BlockSpec((1, tn), lambda i, j, k: (0, j)),
            ],
            out_specs=pl.BlockSpec((tm, tn), lambda i, j, k: (i, j)),
            scratch_shapes=[pltpu.VMEM((tm, tn), jnp.float32)],
            compiler_params=pltpu.CompilerParams(
                dimension_semantics=("parallel", "parallel", "arbitrary"),
                vmem_limit_bytes=48 * 1024 * 1024,
            ),
        )(p, w, b)

    return out[:M, :N]


# ---------------------------------------------------------------------------
# Forward pass (jitted so the im2col transpose / pad / bf16 cast fuse in XLA)
# ---------------------------------------------------------------------------
@functools.partial(jax.jit, static_argnames=("patch_size", "compute_dtype"))
def _patch_embed_forward(x, weight, bias, *, patch_size, compute_dtype):
    B, C, T, H, W = x.shape
    ph, pw = patch_size
    gh, gw = H // ph, W // pw
    M = B * T * gh * gw
    K = C * ph * pw
    N = weight.shape[0]

    # im2col: the 'b c t h w -> (b t) c h w' rearrange and the patch
    # extraction are folded into ONE transpose, written in the compute dtype.
    # Row order = (bt, g_h, g_w) raster (matches conv output flatten(2).T);
    # column order = (c, i, j) (matches Conv2d weight flatten).
    patches = jnp.transpose(
        x.reshape(B, C, T, gh, ph, gw, pw), (0, 2, 3, 5, 1, 4, 6)
    ).reshape(M, K)
    weight_t = weight.reshape(N, K).T  # (K, N)

    out = _patch_proj(patches, weight_t, bias, compute_dtype=compute_dtype)
    return out.reshape(B * T, gh * gw, N)


# ---------------------------------------------------------------------------
# PatchEmbed module equivalent
# ---------------------------------------------------------------------------
class PatchEmbedPallas:
    """Image to Patch Embedding (Conv2d k=s=patch) via a Pallas GEMM kernel."""

    def __init__(self, img_size=16, patch_size=8, in_chans=4, embed_dim=32,
                 key=None, compute_dtype=jnp.bfloat16):
        self.img_size = (img_size, img_size)
        self.patch_size = (patch_size, patch_size)
        self.num_patches = (img_size // patch_size) * (img_size // patch_size)
        self.in_chans = in_chans
        self.embed_dim = embed_dim
        self.compute_dtype = compute_dtype

        if key is None:
            key = jax.random.PRNGKey(0)
        kw, kb = jax.random.split(key)
        # Conv2d weight: (embed_dim, in_chans, ph, pw), bias: (embed_dim,)
        fan_in = in_chans * patch_size * patch_size
        bound = 1.0 / jnp.sqrt(fan_in)
        self.weight = jax.random.uniform(
            kw, (embed_dim, in_chans, patch_size, patch_size),
            minval=-bound, maxval=bound, dtype=jnp.float32)
        self.bias = jax.random.uniform(
            kb, (embed_dim,), minval=-bound, maxval=bound, dtype=jnp.float32)

    def __call__(self, x):
        # x: (B, C, T, H, W) float32
        B, C, T, H, W = x.shape
        out = _patch_embed_forward(
            x, self.weight, self.bias,
            patch_size=self.patch_size, compute_dtype=self.compute_dtype)
        # Matches torch return: (x, T, W) with W = conv-output width
        return out, T, W // self.patch_size[1]


# ---------------------------------------------------------------------------
# Reference (plain JAX) for verification
# ---------------------------------------------------------------------------
def _reference(x, weight, bias, patch_size):
    B, C, T, H, W = x.shape
    x_bt = jnp.transpose(x, (0, 2, 1, 3, 4)).reshape(B * T, C, H, W)
    y = jax.lax.conv_general_dilated(
        x_bt, weight,
        window_strides=(patch_size, patch_size),
        padding="VALID",
        dimension_numbers=("NCHW", "OIHW", "NCHW"),
    ) + bias[None, :, None, None]
    gw = y.shape[-1]
    y = y.reshape(B * T, weight.shape[0], -1).transpose(0, 2, 1)
    return y, T, gw


if __name__ == "__main__":
    key = jax.random.PRNGKey(0)
    kx, kp = jax.random.split(key)

    # Small, module-consistent shapes: B=2, C=4, T=2, H=W=16, patch=8, dim=32
    B, C, T, H, W = 2, 4, 2, 16, 16
    x = jax.random.normal(kx, (B, C, T, H, W), dtype=jnp.float32)

    mod = PatchEmbedPallas(img_size=H, patch_size=8, in_chans=C,
                           embed_dim=32, key=kp)

    out, t_out, w_out = mod(x)
    out = jax.block_until_ready(out)

    ref, t_ref, w_ref = _reference(x, mod.weight, mod.bias, 8)
    assert out.shape == ref.shape == (B * T, mod.num_patches, 32)
    assert (t_out, w_out) == (t_ref, w_ref) == (T, W // 8)
    # bf16 MXU operands with f32 accumulation -> loosened tolerance.
    assert jnp.allclose(out, ref, atol=2e-2, rtol=2e-2)

    print("KERNEL_OK")
</pallas_src>

<mosaic_0001>
module attributes {stable_mosaic.version = 11 : i64} {
  func.func @_proj_kernel_single_k(%arg0: i32, %arg1: i32, %arg2: memref<16x256xbf16, #tpu.memory_space<vmem>>, %arg3: memref<256x128xbf16, #tpu.memory_space<vmem>>, %arg4: memref<1x128xf32, #tpu.memory_space<vmem>>, %arg5: memref<16x128xf32, #tpu.memory_space<vmem>>) attributes {dimension_semantics = [#tpu.dimension_semantics<parallel>, #tpu.dimension_semantics<parallel>], iteration_bounds = array<i64: 1, 1>, scalar_prefetch = 0 : i64, scratch_operands = 0 : i64, tpu.core_type = #tpu.core_type<tc>, window_params = [{transform_indices = @transform_0, window_bounds = array<i64: 16, 256>}, {transform_indices = @transform_1, window_bounds = array<i64: 256, 128>}, {transform_indices = @transform_2, window_bounds = array<i64: 1, 128>}, {transform_indices = @transform_3, window_bounds = array<i64: 16, 128>}]} {
    %c0 = arith.constant 0 : index
    %c0_0 = arith.constant 0 : index
    %0 = vector.load %arg2[%c0, %c0_0] : memref<16x256xbf16, #tpu.memory_space<vmem>>, vector<16x256xbf16>
    %c0_1 = arith.constant 0 : index
    %c0_2 = arith.constant 0 : index
    %1 = vector.load %arg3[%c0_1, %c0_2] : memref<256x128xbf16, #tpu.memory_space<vmem>>, vector<256x128xbf16>
    %cst = arith.constant dense<0.000000e+00> : vector<16x128xf32>
    %2 = tpu.matmul %0, %1, %cst {dimension_numbers = #tpu.dot_dimension_numbers<[1], [0], [0], [1], [0, 0, 1, 1], [], []>} : vector<16x256xbf16>, vector<256x128xbf16>, vector<16x128xf32> -> vector<16x128xf32>
    %c0_3 = arith.constant 0 : index
    %c0_4 = arith.constant 0 : index
    %3 = vector.load %arg4[%c0_3, %c0_4] : memref<1x128xf32, #tpu.memory_space<vmem>>, vector<1x128xf32>
    %4 = vector.broadcast %3 : vector<1x128xf32> to vector<16x128xf32>
    %5 = arith.addf %2, %4 : vector<16x128xf32>
    %c0_5 = arith.constant 0 : index
    %c0_6 = arith.constant 0 : index
    %6 = vector.load %arg5[%c0_5, %c0_6] : memref<16x128xf32, #tpu.memory_space<vmem>>, vector<16x128xf32>
    tpu.vector_store %arg5[%c0_5, %c0_6], %5 {strides = array<i32>} : memref<16x128xf32, #tpu.memory_space<vmem>>, vector<16x128xf32>,
    return
  }
  func.func @transform_0(%arg0: i32, %arg1: i32) -> (i32, i32) {
    %c0_i32 = arith.constant 0 : i32
    %c0_i32_0 = arith.constant 0 : i32
    return %arg0, %c0_i32 : i32, i32
  }
  func.func @transform_1(%arg0: i32, %arg1: i32) -> (i32, i32) {
    %c0_i32 = arith.constant 0 : i32
    %c0_i32_0 = arith.constant 0 : i32
    return %c0_i32, %arg1 : i32, i32
  }
  func.func @transform_2(%arg0: i32, %arg1: i32) -> (i32, i32) {
    %c0_i32 = arith.constant 0 : i32
    %c0_i32_0 = arith.constant 0 : i32
    return %c0_i32, %arg1 : i32, i32
  }
  func.func @transform_3(%arg0: i32, %arg1: i32) -> (i32, i32) {
    %c0_i32 = arith.constant 0 : i32
    return %arg0, %arg1 : i32, i32
  }
}

</mosaic_0001>

<bundles_post_ra>
// kernel: _patch_embed_forward.1
= control target key start
LH: loop header
LB: loop body
LE: loop exit
PB: predicated region body
PF: predicated region fallthrough
CT: control target
= control target key end

     0   :  { %s416_s0 = inlined_call_operand.vmem [shape: bf16[16,256], index: 0, kind: input, shape index: {}]   ;;  %s417_s1 = inlined_call_operand.vmem [shape: bf16[256,128], index: 1, kind: input, shape index: {}]   ;;  %s418_s2 = inlined_call_operand.vmem [shape: f32[1,128], index: 2, kind: input, shape index: {}]   ;;  %s419_s3 = inlined_call_operand.hbm [shape: f32[16,128], index: 3, kind: output, shape index: {}]  }
   0x1   :  { %v288_v0 = vld [vmem:[%s417_s1 + $0x38] sm:$0xff]  ;;  %v287_v2 = vld [vmem:[%s417_s1 + $0x30] sm:$0xff]  ;;  %v286_v4 = vld [vmem:[%s417_s1 + $0x28] sm:$0xff] }
   0x2   :  { %v296_v1 = vld [vmem:[%s417_s1 + $0x78] sm:$0xff]  ;;  %159 = vmatpush.bf16.msra.mxu0 %v288_v0  ;;  %v295_v3 = vld [vmem:[%s417_s1 + $0x70] sm:$0xff]  ;;  %v294_v5 = vld [vmem:[%s417_s1 + $0x68] sm:$0xff] }
   0x3   :  { %173 = vmatpush.bf16.msra.mxu1 %v296_v1 }
   0x6   :  { %160 = vmatpush.bf16.msra.mxu0 %v287_v2 }
   0x7   :  { %174 = vmatpush.bf16.msra.mxu1 %v295_v3 }
   0x8   :  { %8 = vsyncpa [#allocation3], 0  ;;  %v285_v6 = vld [vmem:[%s417_s1 + $0x20] sm:$0xff]  ;;  %v284_v8 = vld [vmem:[%s417_s1 + $0x18] sm:$0xff]  ;;  %s327_s26 = smov [#allocation2]   ;;  %s328_s30 = smov 128  }
   0x9   :  { %v293_v7 = vld [vmem:[%s417_s1 + $0x60] sm:$0xff]  ;;  %v292_v9 = vld [vmem:[%s417_s1 + $0x58] sm:$0xff]  ;;  %v283_v10 = vld [vmem:[%s417_s1 + $0x10] sm:$0xff]  ;;  %s193_s27 = sshll.u32 %s327_s26, 4  ;;  %s194_s27 = int_to_ptr.vmem [resolvable:$true] %s193_s27 }
   0xa   :  { %161 = vmatpush.bf16.msra.mxu0 %v286_v4  ;;  %v291_v11 = vld [vmem:[%s417_s1 + $0x50] sm:$0xff]  ;;  %v282_v12 = vld [vmem:[%s417_s1 + $0x8] sm:$0xff]  ;;  %v281_v14 = vld [vmem:[%s417_s1] sm:$0xff] }
   0xb   :  { %175 = vmatpush.bf16.msra.mxu1 %v294_v5  ;;  %v290_v13 = vld [vmem:[%s417_s1 + $0x48] sm:$0xff]  ;;  %v289_v15 = vld [vmem:[%s417_s1 + $0x40] sm:$0xff] }
   0xc   :  { %v209_v16 = vld [vmem:[%s416_s0] sm:$0xf]  ;;  %v280_v17 = vld [vmem:[%s416_s0 + $0x4] sm:$0xf0]  ;;  %v279_v18 = vld [vmem:[%s416_s0 + $0x4] sm:$0xf] }
   0xd   :  { %v211_v19 = vld [vmem:[%s416_s0 + $0x8] sm:$0xf0]  ;;  %v210_v20 = vor.u32 %v280_v17, %v209_v16  ;;  %v300_v22 = vld [vmem:[%s418_s2] ss:$0 sm:$0xff]  ;;  %s195_s0 = sshll.u32 %s419_s3, 4  ;;  %s329_s2 = smov 8   ;;  %s196_s0 = int_to_ptr.hbm [resolvable:$true] %s195_s0 }
   0xe   :  { %162 = vmatpush.bf16.msra.mxu0 %v285_v6  ;;  %v214_v21 = vor.u32 %v279_v18, %v211_v19 }
   0xf   :  { %176 = vmatpush.bf16.msra.mxu1 %v293_v7 }
  0x12   :  { %163 = vmatpush.bf16.msra.mxu0 %v284_v8 }
  0x13   :  { %177 = vmatpush.bf16.msra.mxu1 %v292_v9 }
  0x16   :  { %164 = vmatpush.bf16.msra.mxu0 %v283_v10 }
  0x17   :  { %178 = vmatpush.bf16.msra.mxu1 %v291_v11 }
  0x1a   :  { %165 = vmatpush.bf16.msra.mxu0 %v282_v12 }
  0x1b   :  { %179 = vmatpush.bf16.msra.mxu1 %v290_v13 }
  0x1e   :  { %166 = vmatpush.bf16.msra.mxu0 %v281_v14 }
  0x1f   :  { %180 = vmatpush.bf16.msra.mxu1 %v289_v15 }
  0x21   :  { %167 = vmatmul.bf16.vlgmr.msra.gmra.mxu0 %v210_v20 }
  0x22   :  { %181 = vmatmul.bf16.vlgmr.msra.gmra.mxu1 %v214_v21 }
  0x9e   :  { %v168_v23 = vpop.f32.mrf.mxu0 }
  0x9f   :  { %v182_v24 = vpop.f32.mrf.mxu1  ;;  %v169_v25 = vadd.f32 %v300_v22, %v168_v23 }
  0xa1   :  { %v183_v26 = vadd.f32 %v182_v24, %v169_v25 }
  0xa3   :  { %187 = vst [vmem:[#allocation2] sm:$0xff] %v183_v26 }
  0xa6   :  { %v170_v27 = vpop.f32.mrf.mxu0 }
  0xa7   :  { %v171_v28 = vadd.f32 %v300_v22, %v170_v27  ;;  %v184_v29 = vpop.f32.mrf.mxu1 }
  0xa9   :  { %v185_v30 = vadd.f32 %v184_v29, %v171_v28 }
  0xab   :  { %188 = vst [vmem:[#allocation2 + $0x8] sm:$0xff] %v185_v30 }
  0xac   :  { %201 = dma.vmem_to_hbm [thread:$0]  %s194_s27, 256, %s196_s0, [#allocation3], %s328_s30, %s328_s30, %s329_s2  }
  0xad   :  { %325 = dma.done.wait [#allocation3], 256  }
  0xae   :  { %326 = vsyncadd [#allocation3], 4294967040 }
  0xaf   :  { %206 = vsyncpa [#allocation3], 1 }

</bundles_post_ra>
